<compile_context>
chip_gen: v7x
topology: tpu7x:2x2x1
jax: 0.10.0
libtpu: 0.0.40
codegen_flags: <defaults>
</compile_context>

<pallas_src>
import functools

import jax
import jax.numpy as jnp
from jax.experimental import pallas as pl
from jax.experimental.pallas import tpu as pltpu


def _self_attention_kernel(bias_ref, m_ref, w_ref, pool_ref, alpha_ref, acc_ref):
    """One grid step: seq-split `c` = program_id(0), seq tile `j` = program_id(1)."""
    j = pl.program_id(1)

    @pl.when(j == 0)
    def _():
        acc_ref[...] = jnp.zeros_like(acc_ref)

    m = m_ref[...]                                                 # (B, ts, D) native dtype
    B, _, D = m.shape
    w = jnp.broadcast_to(w_ref[...].astype(m.dtype), (B, 1, D))    # (B, 1, D)
    bias = bias_ref[0, 0]                                          # scalar (SMEM, f32)

    # scale[b, 0, s] = <M[b, s, :], w> + bias    (nn.Linear(D, 1))  -- MXU, f32 accumulate
    scale = jnp.einsum("bed,bsd->bes", w, m,
                       preferred_element_type=jnp.float32) + bias  # (B, 1, ts) f32

    # softmax over the *batch* axis (dim=0 in the PyTorch module), numerically stable.
    s_max = jnp.max(scale, axis=0, keepdims=True)                  # (1, 1, ts)
    e = jnp.exp(scale - s_max)                                     # (B, 1, ts)
    inv = pl.reciprocal(jnp.sum(e, axis=0, keepdims=True), approx=False)
    alpha = e * inv                                                # (B, 1, ts) f32

    alpha_ref[...] = alpha.astype(alpha_ref.dtype)

    # attn_pool partial: acc[b, 0, :] += sum_s alpha[b, 0, s] * M[b, s, :]   -- MXU
    acc_ref[...] += jnp.einsum("bes,bsd->bed", alpha.astype(m.dtype), m,
                               preferred_element_type=jnp.float32)

    @pl.when(j == pl.num_programs(1) - 1)
    def _():
        pool_ref[...] = acc_ref[...].astype(pool_ref.dtype)


def _physical_vmem_bytes():
    """Per-core VMEM capacity; conservative fallback if the query is unavailable."""
    try:
        info = pltpu.get_tpu_info()
        for attr in ("vmem_capacity_bytes", "vmem_size_bytes", "vmem_bytes"):
            v = getattr(info, attr, None)
            if v:
                return int(v)
    except Exception:
        pass
    return 64 * 1024 * 1024          # v7x per-TensorCore VMEM (smallest current part)


def _choose_tiling(S, bytes_per_col, vmem_limit, forced_ts=None):
    """Returns (n_split, inner_steps, ts, s_pad)."""
    if forced_ts is not None:        # testing / manual tuning; should be a multiple of 128
        ts = forced_ts
        n = -(-S // ts)
        p = 2 if n >= 2 else 1
        n = -(-n // p) * p
        return p, n // p, ts, n * ts

    # Real footprint ~= 2x input tile (double-buffering); keep ~1/3 headroom for the
    # alpha tiles, f32 softmax intermediates and the accumulator.
    max_ts = max(1, (vmem_limit // 3) // bytes_per_col)
    if S <= max_ts:
        if S >= 1024 and S % 256 == 0:
            return 2, 1, S // 2, S   # two lane-dense halves -> both v7x TCs, no padding
        return 1, 1, S, S            # single full-dim tile, no padding
    ts_cap = max(128, (max_ts // 128) * 128)   # may exceed budget only if B*D is huge
    # Prefer a tile size that divides S exactly (avoids a padded copy of M in HBM).
    t = ts_cap
    while t >= 128:
        if S % t == 0 and (S // t) % 2 == 0:
            return 2, (S // t) // 2, t, S
        t -= 128
    n = -(-S // ts_cap)
    n = -(-n // 2) * 2               # even tile count so both seq-splits get work
    ts = ((-(-S // n) + 127) // 128) * 128
    return 2, n // 2, ts, n * ts


@functools.partial(jax.jit, static_argnames=("ts", "inner", "n_split", "vmem_limit"))
def _self_attention_call(M, w2d, bias2d, *, ts, inner, n_split, vmem_limit):
    B, s_pad, D = M.shape
    pool_parts, alpha = pl.pallas_call(
        _self_attention_kernel,
        out_shape=(
            jax.ShapeDtypeStruct((n_split, B, 1, D), jnp.float32),   # per-split partial pools
            jax.ShapeDtypeStruct((B, 1, s_pad), M.dtype),            # alpha, final layout
        ),
        grid_spec=pltpu.PrefetchScalarGridSpec(
            num_scalar_prefetch=0,
            grid=(n_split, inner),
            in_specs=[
                pl.BlockSpec(memory_space=pltpu.MemorySpace.SMEM),               # bias (1, 1)
                pl.BlockSpec((B, ts, D), lambda c, j: (0, c * inner + j, 0)),    # M seq tile
                pl.BlockSpec((1, D), lambda c, j: (0, 0)),                       # weight row
            ],
            out_specs=(
                pl.BlockSpec((None, B, 1, D), lambda c, j: (c, 0, 0, 0)),        # partial pool
                pl.BlockSpec((B, 1, ts), lambda c, j: (0, 0, c * inner + j)),    # alpha tile
            ),
            scratch_shapes=[pltpu.VMEM((B, 1, D), jnp.float32)],
        ),
        compiler_params=pltpu.CompilerParams(
            dimension_semantics=("parallel", "arbitrary"),   # split axis parallel, seq reduce
            vmem_limit_bytes=vmem_limit,
        ),
    )(bias2d, M, w2d)
    return pool_parts, alpha


def self_attention_general(M, weight, bias, *, seq_tile=None):
    """Forward of SelfAttention(att_type='general').

    M: (B, S, D); weight: (D,) = nn.Linear(D, 1).weight[0]; bias: scalar.
    Returns (attn_pool (B, D), alpha (B, 1, S)), matching the PyTorch module.
    `seq_tile` (multiple of 128) overrides the auto tile size (testing / tuning).
    """
    B, S, D = M.shape
    phys = _physical_vmem_bytes()
    vmem_limit = max(32 * 1024 * 1024, min(phys * 3 // 4, 96 * 1024 * 1024))
    itemsize = jnp.dtype(M.dtype).itemsize
    n_split, inner, ts, s_pad = _choose_tiling(S, B * D * itemsize, vmem_limit, seq_tile)

    if s_pad != S:
        # Padded seq rows of M are zero -> contribute nothing to attn_pool; their alpha
        # columns (uniform 1/B) are sliced off below.
        M_in = jnp.pad(M, ((0, 0), (0, s_pad - S), (0, 0)))
    else:
        M_in = M

    w2d = jnp.asarray(weight, dtype=jnp.float32).reshape(1, D)
    bias2d = jnp.asarray(bias, dtype=jnp.float32).reshape(1, 1)

    pool_parts, alpha = _self_attention_call(
        M_in, w2d, bias2d, ts=ts, inner=inner, n_split=n_split, vmem_limit=vmem_limit)
    pool = pool_parts.sum(axis=0)[:, 0, :].astype(M.dtype)   # (B, D)
    return pool, alpha[:, :, :S]                             # (B, 1, S)


def _reference(M, weight, bias):
    """Pure-JAX reference matching the PyTorch 'general' forward."""
    Mf = M.astype(jnp.float32)
    scale = jnp.einsum("bsd,d->bs", Mf, jnp.asarray(weight, jnp.float32)) + bias
    alpha = jax.nn.softmax(scale, axis=0)                    # softmax over batch (dim=0)
    pool = jnp.einsum("bs,bsd->bd", alpha, Mf)
    return pool.astype(M.dtype), alpha[:, None, :].astype(M.dtype)


if __name__ == "__main__":
    key = jax.random.PRNGKey(0)
    k1, k2, k3, k4, k5, k6 = jax.random.split(key, 6)

    # Small shape implied by the module: batch=2, seq=8, hidden=32 (single-tile path).
    batch, seq_len, input_dim = 2, 8, 32
    M = jax.random.normal(k1, (batch, seq_len, input_dim), dtype=jnp.float32)
    weight = jax.random.normal(k2, (input_dim,), dtype=jnp.float32) * 0.1
    bias = jax.random.normal(k3, (), dtype=jnp.float32)

    pool, alpha = self_attention_general(M, weight, bias)
    jax.block_until_ready((pool, alpha))

    ref_pool, ref_alpha = _reference(M, weight, bias)
    assert pool.shape == (batch, input_dim), pool.shape
    assert alpha.shape == (batch, 1, seq_len), alpha.shape
    assert jnp.allclose(pool, ref_pool, rtol=1e-4, atol=1e-4)
    assert jnp.allclose(alpha, ref_alpha, rtol=1e-4, atol=1e-4)

    # Exercise the tiled / padded / 2-way-split path at a still-small shape.
    batch2, seq2, dim2 = 2, 520, 32
    M2 = jax.random.normal(k4, (batch2, seq2, dim2), dtype=jnp.float32)
    w2 = jax.random.normal(k5, (dim2,), dtype=jnp.float32) * 0.1
    b2 = jax.random.normal(k6, (), dtype=jnp.float32)

    pool2, alpha2 = self_attention_general(M2, w2, b2, seq_tile=128)
    jax.block_until_ready((pool2, alpha2))
    rp2, ra2 = _reference(M2, w2, b2)
    assert pool2.shape == (batch2, dim2) and alpha2.shape == (batch2, 1, seq2)
    assert jnp.allclose(pool2, rp2, rtol=1e-4, atol=1e-4)
    assert jnp.allclose(alpha2, ra2, rtol=1e-4, atol=1e-4)

    print("KERNEL_OK")
</pallas_src>

<mosaic_0001>
module attributes {stable_mosaic.version = 11 : i64} {
  func.func @_self_attention_kernel(%arg0: i32, %arg1: i32, %arg2: memref<1x1xf32, #tpu.memory_space<smem>>, %arg3: memref<2x8x32xf32, #tpu.memory_space<vmem>>, %arg4: memref<1x32xf32, #tpu.memory_space<vmem>>, %arg5: memref<1x2x1x32xf32, #tpu.memory_space<vmem>>, %arg6: memref<2x1x8xf32, #tpu.memory_space<vmem>>, %arg7: memref<2x1x32xf32, #tpu.memory_space<vmem>>) attributes {dimension_semantics = [#tpu.dimension_semantics<parallel>, #tpu.dimension_semantics<arbitrary>], iteration_bounds = array<i64: 1, 1>, scalar_prefetch = 0 : i64, scratch_operands = 1 : i64, tpu.core_type = #tpu.core_type<tc>, window_params = [{transform_indices = @transform_0, window_bounds = array<i64: 1, 1>}, {transform_indices = @transform_1, window_bounds = array<i64: 2, 8, 32>}, {pipeline_mode = #tpu.pipeline_mode<synchronous>, transform_indices = @transform_2, window_bounds = array<i64: 1, 32>}, {transform_indices = @transform_3, window_bounds = array<i64: 1, 2, 1, 32>}, {transform_indices = @transform_4, window_bounds = array<i64: 2, 1, 8>}]} {
    %c0_i32 = arith.constant 0 : i32
    %0 = arith.cmpi eq, %arg1, %c0_i32 : i32
    %1 = arith.extui %0 : i1 to i32
    %c0_i32_0 = arith.constant 0 : i32
    %2 = arith.cmpi ne, %1, %c0_i32_0 : i32
    scf.if %2 {
      %cst_21 = arith.constant 0.000000e+00 : f32
      %29 = vector.broadcast %cst_21 : f32 to vector<2x1x32xf32>
      %c0_22 = arith.constant 0 : index
      %c0_23 = arith.constant 0 : index
      %c0_24 = arith.constant 0 : index
      %30 = vector.load %arg7[%c0_22, %c0_23, %c0_24] : memref<2x1x32xf32, #tpu.memory_space<vmem>>, vector<2x1x32xf32>
      tpu.vector_store %arg7[%c0_22, %c0_23, %c0_24], %29 {strides = array<i32>} : memref<2x1x32xf32, #tpu.memory_space<vmem>>, vector<2x1x32xf32>,
    } else {
    }
    %c0 = arith.constant 0 : index
    %c0_1 = arith.constant 0 : index
    %c0_2 = arith.constant 0 : index
    %3 = vector.load %arg3[%c0, %c0_1, %c0_2] : memref<2x8x32xf32, #tpu.memory_space<vmem>>, vector<2x8x32xf32>
    %c0_3 = arith.constant 0 : index
    %c0_4 = arith.constant 0 : index
    %4 = vector.load %arg4[%c0_3, %c0_4] : memref<1x32xf32, #tpu.memory_space<vmem>>, vector<1x32xf32>
    %5 = vector.shape_cast %4 : vector<1x32xf32> to vector<1x1x32xf32>
    %6 = vector.broadcast %5 : vector<1x1x32xf32> to vector<2x1x32xf32>
    %c0_5 = arith.constant 0 : index
    %c0_6 = arith.constant 0 : index
    %7 = memref.load %arg2[%c0_5, %c0_6] : memref<1x1xf32, #tpu.memory_space<smem>>
    "tpu.trace_start"() <{level = 10 : i32, message = "bed,bsd->bes"}> : () -> ()
    %cst = arith.constant dense<0.000000e+00> : vector<2x1x8xf32>
    %8 = tpu.matmul %6, %3, %cst {dimension_numbers = #tpu.dot_dimension_numbers<[2], [2], [1], [1], [0, 0, 0, 1, 1, 1], [0], [0]>} : vector<2x1x32xf32>, vector<2x8x32xf32>, vector<2x1x8xf32> -> vector<2x1x8xf32>
    "tpu.trace_stop"() : () -> ()
    %9 = vector.broadcast %7 : f32 to vector<2x1x8xf32>
    %10 = arith.addf %8, %9 : vector<2x1x8xf32>
    %cst_7 = arith.constant dense<0xFF800000> : vector<1x8xf32>
    %11 = vector.multi_reduction <maximumf>, %10, %cst_7 [0] : vector<2x1x8xf32> to vector<1x8xf32>
    %12 = vector.shape_cast %11 : vector<1x8xf32> to vector<1x1x8xf32>
    %13 = vector.broadcast %12 : vector<1x1x8xf32> to vector<2x1x8xf32>
    %14 = arith.subf %10, %13 : vector<2x1x8xf32>
    %15 = math.exp %14 : vector<2x1x8xf32>
    %cst_8 = arith.constant dense<0.000000e+00> : vector<1x8xf32>
    %16 = vector.multi_reduction <add>, %15, %cst_8 [0] : vector<2x1x8xf32> to vector<1x8xf32>
    %17 = vector.shape_cast %16 : vector<1x8xf32> to vector<1x1x8xf32>
    %18 = tpu.reciprocal %17 : vector<1x1x8xf32> -> vector<1x1x8xf32>
    %19 = vector.broadcast %18 : vector<1x1x8xf32> to vector<2x1x8xf32>
    %20 = arith.mulf %15, %19 : vector<2x1x8xf32>
    %c0_9 = arith.constant 0 : index
    %c0_10 = arith.constant 0 : index
    %c0_11 = arith.constant 0 : index
    %21 = vector.load %arg6[%c0_9, %c0_10, %c0_11] : memref<2x1x8xf32, #tpu.memory_space<vmem>>, vector<2x1x8xf32>
    tpu.vector_store %arg6[%c0_9, %c0_10, %c0_11], %20 {strides = array<i32>} : memref<2x1x8xf32, #tpu.memory_space<vmem>>, vector<2x1x8xf32>,
    %c0_12 = arith.constant 0 : index
    %c0_13 = arith.constant 0 : index
    %c0_14 = arith.constant 0 : index
    %22 = vector.load %arg7[%c0_12, %c0_13, %c0_14] : memref<2x1x32xf32, #tpu.memory_space<vmem>>, vector<2x1x32xf32>
    "tpu.trace_start"() <{level = 10 : i32, message = "bes,bsd->bed"}> : () -> ()
    %cst_15 = arith.constant dense<0.000000e+00> : vector<2x1x32xf32>
    %23 = tpu.matmul %20, %3, %cst_15 {dimension_numbers = #tpu.dot_dimension_numbers<[2], [1], [1], [2], [0, 0, 0, 1, 1, 2], [0], [0]>} : vector<2x1x8xf32>, vector<2x8x32xf32>, vector<2x1x32xf32> -> vector<2x1x32xf32>
    "tpu.trace_stop"() : () -> ()
    %24 = arith.addf %22, %23 : vector<2x1x32xf32>
    %c0_16 = arith.constant 0 : index
    %c0_17 = arith.constant 0 : index
    %c0_18 = arith.constant 0 : index
    %25 = vector.load %arg7[%c0_16, %c0_17, %c0_18] : memref<2x1x32xf32, #tpu.memory_space<vmem>>, vector<2x1x32xf32>
    tpu.vector_store %arg7[%c0_16, %c0_17, %c0_18], %24 {strides = array<i32>} : memref<2x1x32xf32, #tpu.memory_space<vmem>>, vector<2x1x32xf32>,
    %c0_i32_19 = arith.constant 0 : i32
    %26 = arith.cmpi eq, %arg1, %c0_i32_19 : i32
    %27 = arith.extui %26 : i1 to i32
    %c0_i32_20 = arith.constant 0 : i32
    %28 = arith.cmpi ne, %27, %c0_i32_20 : i32
    scf.if %28 {
      %c0_21 = arith.constant 0 : index
      %c0_22 = arith.constant 0 : index
      %c0_23 = arith.constant 0 : index
      %29 = vector.load %arg7[%c0_21, %c0_22, %c0_23] : memref<2x1x32xf32, #tpu.memory_space<vmem>>, vector<2x1x32xf32>
      %c0_24 = arith.constant 0 : index
      %c0_25 = arith.constant 0 : index
      %c0_26 = arith.constant 0 : index
      %c0_27 = arith.constant 0 : index
      %30 = vector.load %arg5[%c0_24, %c0_25, %c0_26, %c0_27] : memref<1x2x1x32xf32, #tpu.memory_space<vmem>>, vector<1x2x1x32xf32>
      %31 = vector.shape_cast %30 : vector<1x2x1x32xf32> to vector<2x1x32xf32>
      %32 = vector.shape_cast %29 : vector<2x1x32xf32> to vector<1x2x1x32xf32>
      tpu.vector_store %arg5[%c0_24, %c0_25, %c0_26, %c0_27], %32 {strides = array<i32>} : memref<1x2x1x32xf32, #tpu.memory_space<vmem>>, vector<1x2x1x32xf32>,
    } else {
    }
    return
  }
  func.func @transform_0(%arg0: i32, %arg1: i32) -> (i32, i32) {
    %c0_i32 = arith.constant 0 : i32
    %c0_i32_0 = arith.constant 0 : i32
    %c0_i32_1 = arith.constant 0 : i32
    return %c0_i32, %c0_i32_0 : i32, i32
  }
  func.func @transform_1(%arg0: i32, %arg1: i32) -> (i32, i32, i32) {
    %c1_i32 = arith.constant 1 : i32
    %0 = arith.muli %arg0, %c1_i32 : i32
    %1 = arith.addi %0, %arg1 : i32
    %c0_i32 = arith.constant 0 : i32
    %c0_i32_0 = arith.constant 0 : i32
    %c0_i32_1 = arith.constant 0 : i32
    return %c0_i32, %1, %c0_i32_0 : i32, i32, i32
  }
  func.func @transform_2(%arg0: i32, %arg1: i32) -> (i32, i32) {
    %c0_i32 = arith.constant 0 : i32
    %c0_i32_0 = arith.constant 0 : i32
    %c0_i32_1 = arith.constant 0 : i32
    return %c0_i32, %c0_i32_0 : i32, i32
  }
  func.func @transform_3(%arg0: i32, %arg1: i32) -> (i32, i32, i32, i32) {
    %c0_i32 = arith.constant 0 : i32
    %c0_i32_0 = arith.constant 0 : i32
    %c0_i32_1 = arith.constant 0 : i32
    %c0_i32_2 = arith.constant 0 : i32
    return %arg0, %c0_i32, %c0_i32_0, %c0_i32_1 : i32, i32, i32, i32
  }
  func.func @transform_4(%arg0: i32, %arg1: i32) -> (i32, i32, i32) {
    %c1_i32 = arith.constant 1 : i32
    %0 = arith.muli %arg0, %c1_i32 : i32
    %1 = arith.addi %0, %arg1 : i32
    %c0_i32 = arith.constant 0 : i32
    %c0_i32_0 = arith.constant 0 : i32
    %c0_i32_1 = arith.constant 0 : i32
    return %c0_i32, %c0_i32_0, %1 : i32, i32, i32
  }
}

</mosaic_0001>

<bundles_post_ra>
// kernel: _self_attention_call.1
= control target key start
LH: loop header
LB: loop body
LE: loop exit
PB: predicated region body
PF: predicated region fallthrough
CT: control target
= control target key end

     0   :  { %11 = vsyncpa [#allocation5], 0  ;;  %s634_s0 = inlined_call_operand.<no memory space> [shape: f32[1,1], index: 0, kind: input, shape index: {}]   ;;  %s635_s1 = inlined_call_operand.hbm [shape: f32[2,8,32], index: 1, kind: input, shape index: {}]   ;;  %s636_s2 = inlined_call_operand.vmem [shape: f32[1,32], index: 2, kind: input, shape index: {}]   ;;  %s637_s3 = inlined_call_operand.hbm [shape: f32[1,2,1,32], index: 3, kind: output, shape index: {0}]   ;;  %s638_s4 = inlined_call_operand.hbm [shape: f32[2,1,8], index: 4, kind: output, shape index: {1}]  }
   0x1   :  { %12 = vsyncpa [#allocation6], 0 }
   0x2   :  { %13 = vsyncpa [#allocation9], 0  ;;  %s536_s15 = smov [#allocation4]   ;;  %s464_s19 = scalar_lea.hbm %s635_s1, 256 }
   0x3   :  { %s24_s16 = sshll.u32 %s536_s15, 4  ;;  %p465_p0 = scmp.ne.s32.totalorder %s635_s1, %s464_s19  ;;  %s25_s16 = int_to_ptr.vmem [resolvable:$true] %s24_s16 }
   0x4   :  { %p468_p1 = scmp.lt.u32.totalorder %s464_s19, %s635_s1 }
   0x6   :  { %p470_p2 = pnand %p468_p1, %p465_p0 }
   0x8   :  { %473 = shalt.err (!%p470_p2)
}
   0x9   :  { %s474_s24 = scalar_lea.vmem %s25_s16, 256  ;;  %p479_p4 = scmp.lt.s32.totalorder %s25_s16, %s25_s16 }
   0xa   :  { %p475_p3 = scmp.ne.s32.totalorder %s25_s16, %s474_s24  ;;  %p480_p5 = scmp.lt.s32.totalorder %s474_s24, %s474_s24 }
   0xc   :  { %p481_p6 = por %p480_p5, %p479_p4 }
   0xe   :  { %p482_p7 = pnand %p481_p6, %p475_p3 }
  0x10   :  { %485 = shalt.err (!%p482_p7)
}
  0x11   :  { %s537_s25 = smov 128   ;;  %s538_s26 = smov 8  }
  0x12   :  { %30 = dma.hbm_to_vmem [thread:$0]  %s635_s1, 256, %s25_s16, [#allocation5], %s537_s25, %s537_s25, %s538_s26  }
  0x13   :  { %530 = dma.done.wait [#allocation5], 256  }
  0x14   :  { %531 = vsyncadd [#allocation5], 4294967040  ;;  %v539_v0 = vmov 0.0   ;;  %vm540_vm0 = vmmov 0   ;;  %vm50_vm1 = vcmask 261120   ;;  %v45_v1 = vld [vmem:[#allocation4] sm:$0xff]  ;;  %v49_v4 = vstv %s634_s0 }
  0x15   :  { %429 = vmatprep.subr.mxu0 %v539_v0  ;;  %434 = vmatprep.subr.mxu1 %v539_v0  ;;  %v46_v2 = vld [vmem:[#allocation4 + $0x8] sm:$0xff]  ;;  %v47_v3 = vld [vmem:[%s636_s2] sm:$0x1]  ;;  %vm42_vm2 = vcmask 253952   ;;  %vm200_vm3 = vcmask 57344   ;;  %vm220_vm4 = vcmask 64512  }
  0x16   :  { %431 = vmatprep.mubr.msk.f32.mxu0 %vm540_vm0, %v539_v0  ;;  %436 = vmatprep.mubr.msk.f32.mxu1 %vm540_vm0, %v539_v0  ;;  %43 = vst.msk [vmem:[#allocation2] sm:$0x1] %vm42_vm2, %v539_v0  ;;  %44 = vst.msk [vmem:[#allocation2 + $0x1] sm:$0x1] %vm42_vm2, %v539_v0  ;;  %s541_s0 = smov [#allocation8]  }
  0x17   :  { %430 = vmatpush3.xpose.msk.msra.mxu0 %vm50_vm1, %v45_v1  ;;  %435 = vmatpush3.xpose.msk.msra.mxu1 %vm50_vm1, %v46_v2  ;;  %s399_s2 = sshll.u32 %s541_s0, 4  ;;  %s400_s2 = int_to_ptr.vmem [resolvable:$true] %s399_s2 }
  0x18   :  { %439 = vmatprep.subr.mxu0 %v539_v0  ;;  %444 = vmatprep.subr.mxu1 %v539_v0  ;;  %s486_s6 = scalar_lea.vmem %s400_s2, 32  ;;  %p491_p9 = scmp.lt.s32.totalorder %s400_s2, %s400_s2 }
  0x19   :  { %p487_p8 = scmp.ne.s32.totalorder %s400_s2, %s486_s6  ;;  %p492_p10 = scmp.lt.s32.totalorder %s486_s6, %s486_s6 }
  0x1a   :  { %432 = vmatmul.mubr.msk.f32.vlgmr.msra.gmra.mrb[0].mxu0 %vm50_vm1, %v47_v3  ;;  %437 = vmatmul.mubr.msk.f32.vlgmr.msra.gmra.mrb[0].mxu1 %vm50_vm1, %v47_v3 }
  0x1b   :  { %440 = vmatpush3.msra.mxu0 %v45_v1  ;;  %445 = vmatpush3.msra.mxu1 %v46_v2  ;;  %p493_p11 = por %p492_p10, %p491_p9 }
  0x1c   :  { %441 = vmatprep.mubr.msk.f32.mxu0 %vm540_vm0, %v539_v0  ;;  %446 = vmatprep.mubr.msk.f32.mxu1 %vm540_vm0, %v539_v0 }
  0x1d   :  { %p494_p12 = pnand %p493_p11, %p487_p8 }
  0xed   :  { %v123_v5 = vpop.f32.mrb[0].mxu0  ;;  %v196_v6 = vpop.f32.mrb[0].mxu1 }
  0xee   :  { %v124_v7 = vadd.f32 %v123_v5, %v49_v4  ;;  %v197_v8 = vadd.f32 %v196_v6, %v49_v4  ;;  %v433_v9 = vpop.f32.mrb[1].mxu0  ;;  %v438_v10 = vpop.f32.mrb[1].mxu1 }
  0xf0   :  { %v201_v11 = vsel %vm200_vm3, %v124_v7, -inf  ;;  %v202_v12 = vsel %vm200_vm3, %v197_v8, -inf }
  0xf1   :  { %v203_v13 = vmax.f32 %v201_v11, %v202_v12 }
  0xf3   :  { %v204_v14 = vsub.f32 %v124_v7, %v203_v13  ;;  %v205_v15 = vsub.f32 %v197_v8, %v203_v13 }
  0xf5   :  { %v206_v16 = vmul.f32 1.442695, %v204_v14  ;;  %v208_v17 = vmul.f32 1.442695, %v205_v15 }
  0xf7   :  { %458 = vpow2.f32 %v206_v16 }
  0xf8   :  { %460 = vpow2.f32 %v208_v17 }
 0x101   :  { %v459_v18 = vpop.eup %458 }
 0x102   :  { %v461_v19 = vpop.eup %460  ;;  %v210_v20 = vsel %vm200_vm3, %v459_v18, 0.0 }
 0x103   :  { %v211_v21 = vsel %vm200_vm3, %v461_v19, 0.0 }
 0x104   :  { %v212_v22 = vadd.f32 %v211_v21, %v210_v20 }
 0x106   :  { %462 = vrcp.f32 %v212_v22 }
 0x110   :  { %v463_v23 = vpop.eup %462 }
 0x111   :  { %v214_v24 = vmul.f32 %v463_v23, %v459_v18  ;;  %v215_v25 = vmul.f32 %v463_v23, %v461_v19 }
 0x113   :  { %442 = vmatmul.mubr.msk.f32.vlgmr.msra.gmra.mrb[2].mxu0 %vm220_vm4, %v214_v24  ;;  %216 = vst.msk [vmem:[#allocation8] sm:$0x1] %vm200_vm3, %v214_v24  ;;  %447 = vmatmul.mubr.msk.f32.vlgmr.msra.gmra.mrb[2].mxu1 %vm220_vm4, %v215_v25  ;;  %217 = vst.msk [vmem:[#allocation8 + $0x1] sm:$0x1] %vm200_vm3, %v215_v25 }
 0x114   :  { %497 = shalt.err (!%p494_p12)
}
 0x115   :  { %s498_s9 = scalar_lea.hbm %s638_s4, 32 }
 0x116   :  { %p499_p13 = scmp.ne.s32.totalorder %s638_s4, %s498_s9  ;;  %p502_p0 = scmp.lt.u32.totalorder %s498_s9, %s638_s4 }
 0x118   :  { %p504_p1 = pnand %p502_p0, %p499_p13 }
 0x11a   :  { %507 = shalt.err (!%p504_p1)
}
 0x11b   :  { %s542_s14 = smov 16   ;;  %s543_s15 = smov 1   ;;  %v218_v26 = vld [vmem:[#allocation2] sm:$0x1]  ;;  %v219_v27 = vld [vmem:[#allocation2 + $0x1] sm:$0x1] }
 0x11c   :  { %405 = dma.vmem_to_hbm [thread:$0]  %s400_s2, 32, %s638_s4, [#allocation9], %s542_s14, %s542_s14, %s543_s15  }
 0x11d   :  { %s544_s18 = smov [#allocation7]  }
 0x11e   :  { %s384_s19 = sshll.u32 %s544_s18, 4  ;;  %s385_s19 = int_to_ptr.vmem [resolvable:$true] %s384_s19 }
 0x11f   :  { %s508_s4 = scalar_lea.vmem %s385_s19, 32  ;;  %p513_p3 = scmp.lt.s32.totalorder %s385_s19, %s385_s19 }
 0x120   :  { %p509_p2 = scmp.ne.s32.totalorder %s385_s19, %s508_s4  ;;  %p514_p4 = scmp.lt.s32.totalorder %s508_s4, %s508_s4 }
 0x122   :  { %p515_p5 = por %p514_p4, %p513_p3 }
 0x124   :  { %p516_p6 = pnand %p515_p5, %p509_p2 }
 0x1e6   :  { %v290_v28 = vpop.f32.mrb[2].mxu0  ;;  %v363_v29 = vpop.f32.mrb[2].mxu1 }
 0x1e7   :  { %v367_v30 = vadd.f32 %v290_v28, %v218_v26  ;;  %v368_v31 = vadd.f32 %v363_v29, %v219_v27  ;;  %v443_v32 = vpop.f32.mrb[3].mxu0  ;;  %v448_v33 = vpop.f32.mrb[3].mxu1 }
 0x1e9   :  { %370 = vst.msk [vmem:[#allocation2] sm:$0x1] %vm42_vm2, %v367_v30  ;;  %371 = vst.msk [vmem:[#allocation2 + $0x1] sm:$0x1] %vm42_vm2, %v368_v31 }
 0x1f0   :  { %v375_v34 = vld [vmem:[#allocation2] sm:$0x1]  ;;  %v376_v35 = vld [vmem:[#allocation2 + $0x1] sm:$0x1] }
 0x1f1   :  { %377 = vst.msk [vmem:[#allocation7] sm:$0x1] %vm42_vm2, %v375_v34  ;;  %378 = vst.msk [vmem:[#allocation7 + $0x1] sm:$0x1] %vm42_vm2, %v376_v35 }
 0x1f2   :  { %519 = shalt.err (!%p516_p6)
}
 0x1f3   :  { %s520_s22 = scalar_lea.hbm %s637_s3, 32 }
 0x1f4   :  { %p521_p7 = scmp.ne.s32.totalorder %s637_s3, %s520_s22  ;;  %p524_p8 = scmp.lt.u32.totalorder %s520_s22, %s637_s3 }
 0x1f6   :  { %p526_p9 = pnand %p524_p8, %p521_p7 }
 0x1f8   :  { %529 = shalt.err (!%p526_p9)
}
 0x1f9   :  { %390 = dma.vmem_to_hbm [thread:$0]  %s385_s19, 32, %s637_s3, [#allocation6], %s542_s14, %s542_s14, %s543_s15  }
 0x1fa   :  { %532 = dma.done.wait [#allocation6], 32  }
 0x1fb   :  { %533 = vsyncadd [#allocation6], 4294967264 }
 0x1fc   :  { %534 = dma.done.wait [#allocation9], 32  }
 0x1fd   :  { %535 = vsyncadd [#allocation9], 4294967264 }
 0x1fe   :  { %412 = vsyncpa [#allocation5], 1 }
 0x1ff   :  { %413 = vsyncpa [#allocation6], 1 }
 0x200   :  { %414 = vsyncpa [#allocation9], 1 }

</bundles_post_ra>
